<compile_context>
chip_gen: v6e
topology: v6e:2x2x1
jax: 0.10.0
libtpu: 0.0.40
codegen_flags: <defaults>
</compile_context>

<pallas_src>
import jax
import jax.numpy as jnp
from jax.experimental import pallas as pl
from jax.experimental.pallas import tpu as pltpu


def _round_up(x, m):
    return ((x + m - 1) // m) * m


def _make_kernel(precision):
    def kernel(x_ref, w_ref, b_ref, o_ref):
        # x_ref: (TM, K) flattened patch rows (compute dtype)
        # w_ref: (K, TN) weight slice, canonical (K, E) layout (compute dtype)
        # b_ref: (1, TN) bias slice (f32)
        # o_ref: (TM, TN) output tile
        acc = jnp.dot(
            x_ref[...], w_ref[...],
            preferred_element_type=jnp.float32,
            precision=precision,
        )
        o_ref[...] = (acc + b_ref[...]).astype(o_ref.dtype)
    return kernel


def patch_embed(x, weight, bias, patch_size, *,
                compute_dtype=None, tm_max=2048, tn_max=512, precision=None):
    """PatchEmbed forward (flatten=True, norm=Identity).

    x:      (B, C, H, W)          NCHW, like PyTorch
    weight: (embed_dim, C, p, p)  Conv2d weight, like PyTorch
    bias:   (embed_dim,)
    compute_dtype: None (keep x.dtype, f32 parity) or jnp.bfloat16 for native
                   MXU bf16 operands with f32 accumulation.
    returns (B, num_patches, embed_dim)
    """
    B, C, H, W = x.shape
    p = patch_size
    assert H % p == 0 and W % p == 0, "image size must be divisible by patch size"
    gh, gw = H // p, W // p
    num_patches = gh * gw
    E = weight.shape[0]
    K = C * p * p
    M = B * num_patches

    out_dtype = x.dtype
    cdtype = jnp.dtype(compute_dtype) if compute_dtype is not None else jnp.dtype(x.dtype)

    # --- glue: extract non-overlapping patches.  Pad-free, so XLA can fuse the
    # 6-D transpose into the kernel operand (allow_input_fusion below).
    # TODO(synk): verify in the compiled HLO that this transpose fuses; if not,
    # an NHWC input layout or an in-kernel gather would avoid a materialization.
    patches = (x.reshape(B, C, gh, p, gw, p)
                 .transpose(0, 2, 4, 1, 3, 5)
                 .reshape(M, K)).astype(cdtype)
    # One-time weight transpose to the canonical (K, E) MXU layout.
    w_mat = weight.reshape(E, K).T.astype(cdtype)           # (K, E)
    b_mat = bias.reshape(1, E).astype(jnp.float32)          # f32 bias add

    in_item = cdtype.itemsize
    out_item = jnp.dtype(out_dtype).itemsize

    # --- per-generation VMEM budget: 128 MiB physical on v5e/v6e, 64 MiB/TC on
    # v7x.  Fall back to the smallest (v7x-safe) value if the query fails.
    try:
        vmem_phys = int(pltpu.get_tpu_info().vmem_capacity_bytes)
    except Exception:
        vmem_phys = 64 * 1024 * 1024
    vmem_limit = min(vmem_phys * 3 // 4, 100 * 1024 * 1024)
    tile_budget = vmem_limit * 2 // 3

    # --- embed-dim tiling: keep the whole weight resident in VMEM whenever it
    # fits (typical patch-embed weights are only a few MiB), so it is fetched
    # from HBM exactly once and the output store is one wide lane-dense slab.
    weight_resident = (2 * K * E * in_item) <= tile_budget // 2
    if weight_resident:
        TN, E_pad = E, E
    else:
        # Fallback for very large embed dims: tile E in 128-multiples.
        E_pad = _round_up(E, 128)
        TN = 128
        for cand in (512, 384, 256, 128):
            if cand <= min(tn_max, E_pad) and E_pad % cand == 0:
                TN = cand
                break
        w_mat = jnp.pad(w_mat, ((0, 0), (0, E_pad - E)))
        b_mat = jnp.pad(b_mat, ((0, 0), (0, E_pad - E)))

    # --- row tile from the VMEM budget: double-buffered x / w / out tiles plus
    # the f32 matmul result held before the cast to the output dtype.
    def footprint(tm):
        return (2 * tm * K * in_item        # x tile (double-buffered)
                + 2 * K * TN * in_item      # weight tile (double-buffer bound)
                + 2 * tm * TN * out_item    # output tile (double-buffered)
                + tm * TN * 4               # f32 accumulator / bias add
                + 2 * TN * 4)               # bias

    TM = 16                                 # multiple of 16: bf16 sublane pack
    while TM * 2 <= max(16, tm_max) and footprint(TM * 2) <= tile_budget:
        TM *= 2
    TM = min(TM, _round_up(M, 16))
    # v7x megacore: prefer >= 2 row tiles so both TensorCores get work under
    # "parallel" semantics; harmless on single-TC v5e/v6e.
    if pl.cdiv(M, TM) == 1 and M >= 32:
        TM = _round_up(pl.cdiv(M, 2), 16)

    grid = (pl.cdiv(M, TM), E_pad // TN)    # ragged last M tile handled by Pallas

    cost = pl.CostEstimate(
        flops=2 * M * K * E,
        transcendentals=0,
        bytes_accessed=in_item * (M * K + K * E) + out_item * M * E + 4 * E,
    )

    out = pl.pallas_call(
        _make_kernel(precision),
        out_shape=jax.ShapeDtypeStruct((M, E_pad), out_dtype),
        grid_spec=pltpu.PrefetchScalarGridSpec(
            num_scalar_prefetch=0,
            grid=grid,
            in_specs=[
                pl.BlockSpec((TM, K), lambda i, j: (i, 0)),    # patch rows
                pl.BlockSpec((K, TN), lambda i, j: (0, j)),    # weight (resident when E-tiles == 1)
                pl.BlockSpec((1, TN), lambda i, j: (0, j)),    # bias slice
            ],
            out_specs=pl.BlockSpec((TM, TN), lambda i, j: (i, j)),
        ),
        compiler_params=pltpu.CompilerParams(
            dimension_semantics=("parallel", "parallel"),
            vmem_limit_bytes=vmem_limit,
            # Let XLA fuse the patch reshape/transpose into the kernel operand.
            allow_input_fusion=[True, False, False],
        ),
        cost_estimate=cost,
    )(patches, w_mat, b_mat)

    if E_pad != E:
        out = out[:, :E]
    # flatten=True: conv(x).flatten(2).transpose(1, 2); norm_layer=None -> Identity.
    return out.reshape(B, num_patches, E)


if __name__ == "__main__":
    # Small shapes consistent with the module:
    # img_size=16, patch_size=4, in_chans=4, embed_dim=32, batch=2
    B, C, H, W = 2, 4, 16, 16
    p = 4
    embed_dim = 32

    key = jax.random.PRNGKey(0)
    kx, kw, kb = jax.random.split(key, 3)

    x = jax.random.normal(kx, (B, C, H, W), dtype=jnp.float32)
    # Deterministic synthetic Conv2d params (same shapes as nn.Conv2d(C, E, p, p)).
    weight = jax.random.normal(kw, (embed_dim, C, p, p), dtype=jnp.float32) * 0.02
    bias = jax.random.normal(kb, (embed_dim,), dtype=jnp.float32) * 0.02

    fwd = jax.jit(patch_embed, static_argnames=("patch_size", "compute_dtype"))

    out = jax.block_until_ready(fwd(x, weight, bias, patch_size=p))

    # Reference: einsum-based patch projection (same math as the strided conv).
    gh, gw = H // p, W // p
    ref_patches = x.reshape(B, C, gh, p, gw, p).transpose(0, 2, 4, 1, 3, 5)
    ref_patches = ref_patches.reshape(B, gh * gw, C * p * p)
    ref = jnp.einsum("bnk,ek->bne", ref_patches, weight.reshape(embed_dim, -1)) + bias
    assert out.shape == (B, gh * gw, embed_dim)
    assert jnp.allclose(out, ref, atol=1e-4, rtol=1e-4)

    # Optional bf16-MXU path (f32 accumulation) — looser tolerance.
    out_bf16 = jax.block_until_ready(
        fwd(x, weight, bias, patch_size=p, compute_dtype=jnp.bfloat16))
    assert out_bf16.shape == (B, gh * gw, embed_dim)
    assert jnp.allclose(out_bf16, ref, atol=1e-2, rtol=1e-2)

    print("KERNEL_OK")
</pallas_src>

<mosaic_0001>
module attributes {stable_mosaic.version = 11 : i64} {
  func.func @kernel(%arg0: i32, %arg1: i32, %arg2: memref<16x64xf32, #tpu.memory_space<vmem>>, %arg3: memref<64x32xf32, #tpu.memory_space<vmem>>, %arg4: memref<1x32xf32, #tpu.memory_space<vmem>>, %arg5: memref<16x32xf32, #tpu.memory_space<vmem>>) attributes {dimension_semantics = [#tpu.dimension_semantics<parallel>, #tpu.dimension_semantics<parallel>], iteration_bounds = array<i64: 2, 1>, scalar_prefetch = 0 : i64, scratch_operands = 0 : i64, tpu.core_type = #tpu.core_type<tc>, window_params = [{transform_indices = @transform_0, window_bounds = array<i64: 16, 64>}, {transform_indices = @transform_1, window_bounds = array<i64: 64, 32>}, {transform_indices = @transform_2, window_bounds = array<i64: 1, 32>}, {transform_indices = @transform_3, window_bounds = array<i64: 16, 32>}]} {
    %c0 = arith.constant 0 : index
    %c0_0 = arith.constant 0 : index
    %0 = vector.load %arg2[%c0, %c0_0] : memref<16x64xf32, #tpu.memory_space<vmem>>, vector<16x64xf32>
    %c0_1 = arith.constant 0 : index
    %c0_2 = arith.constant 0 : index
    %1 = vector.load %arg3[%c0_1, %c0_2] : memref<64x32xf32, #tpu.memory_space<vmem>>, vector<64x32xf32>
    %cst = arith.constant dense<0.000000e+00> : vector<16x32xf32>
    %2 = tpu.matmul %0, %1, %cst {dimension_numbers = #tpu.dot_dimension_numbers<[1], [0], [0], [1], [0, 0, 1, 1], [], []>} : vector<16x64xf32>, vector<64x32xf32>, vector<16x32xf32> -> vector<16x32xf32>
    %c0_3 = arith.constant 0 : index
    %c0_4 = arith.constant 0 : index
    %3 = vector.load %arg4[%c0_3, %c0_4] : memref<1x32xf32, #tpu.memory_space<vmem>>, vector<1x32xf32>
    %4 = vector.broadcast %3 : vector<1x32xf32> to vector<16x32xf32>
    %5 = arith.addf %2, %4 : vector<16x32xf32>
    %c0_5 = arith.constant 0 : index
    %c0_6 = arith.constant 0 : index
    %6 = vector.load %arg5[%c0_5, %c0_6] : memref<16x32xf32, #tpu.memory_space<vmem>>, vector<16x32xf32>
    tpu.vector_store %arg5[%c0_5, %c0_6], %5 {strides = array<i32>} : memref<16x32xf32, #tpu.memory_space<vmem>>, vector<16x32xf32>,
    return
  }
  func.func @transform_0(%arg0: i32, %arg1: i32) -> (i32, i32) {
    %c0_i32 = arith.constant 0 : i32
    %c0_i32_0 = arith.constant 0 : i32
    return %arg0, %c0_i32 : i32, i32
  }
  func.func @transform_1(%arg0: i32, %arg1: i32) -> (i32, i32) {
    %c0_i32 = arith.constant 0 : i32
    %c0_i32_0 = arith.constant 0 : i32
    return %c0_i32, %arg1 : i32, i32
  }
  func.func @transform_2(%arg0: i32, %arg1: i32) -> (i32, i32) {
    %c0_i32 = arith.constant 0 : i32
    %c0_i32_0 = arith.constant 0 : i32
    return %c0_i32, %arg1 : i32, i32
  }
  func.func @transform_3(%arg0: i32, %arg1: i32) -> (i32, i32) {
    %c0_i32 = arith.constant 0 : i32
    return %arg0, %arg1 : i32, i32
  }
}

</mosaic_0001>

<bundles_post_ra>
// kernel: patch_embed.1
= control target key start
LH: loop header
LB: loop body
LE: loop exit
PB: predicated region body
PF: predicated region fallthrough
CT: control target
= control target key end

     0   :  { %8 = vsyncpa [#allocation3], 0  ;;  %s781_s0 = inlined_call_operand.vmem [shape: f32[32,64], index: 0, kind: input, shape index: {}]   ;;  %s782_s1 = inlined_call_operand.vmem [shape: f32[64,32], index: 1, kind: input, shape index: {}]   ;;  %s783_s2 = inlined_call_operand.vmem [shape: f32[1,32], index: 2, kind: input, shape index: {}]   ;;  %s784_s3 = inlined_call_operand.hbm [shape: f32[32,32], index: 3, kind: output, shape index: {}]  }
   0x1   :  { %10 = vsyncpa [#allocation3 + $0x1], 0  ;;  %s639_s12 = smov 0   ;;  %s641_s13 = smov 0  }
   0x2   :  { %s643_s14 = smov 0   ;;  %s645_s15 = smov 0  }
   0x3   :  { %s647_s16 = smov 0   ;;  %s649_s17 = smov 0  }
   0x4 LB: > { %s433_s18 = sadd.s32 4294967295, %s614_s17   ;;  %s434_s19 = sadd.s32 4294967294, %s614_s17   ;;  %s614_s17 = sphi %s649_s17, %s16_s17   ;;  %s610_s16 = sphi %s647_s16, %s791_s16   ;;  %s606_s15 = sphi %s645_s15, %s790_s15   ;;  %s602_s14 = sphi %s643_s14, %s789_s14   ;;  %s598_s13 = sphi %s641_s13, %s788_s13   ;;  %s594_s12 = sphi %s639_s12, %s787_s12  }
   0x5   : > { %s28_s20 = sadd.s32 1, %s610_s16  ;;  %s115_s21 = sadd.s32 1, %s602_s14 }
   0x6   : > { %p30_p0 = scmp.ge.s32.totalorder %s28_s20, 2  ;;  %p125_p1 = scmp.ne.s32.totalorder %s602_s14, %s598_s13 }
   0x7   : > { %p126_p2 = scmp.eq.s32.totalorder %s433_s18, 1  ;;  %p131_p3 = scmp.ne.s32.totalorder %s598_s13, %s594_s12 }
   0x8   : > { %s793_s20 = smov (%p30_p0, %s28_s20), 0  ;;  %p132_p5 = scmp.eq.s32.totalorder %s434_s19, 1 }
   0x9   : > { %p679_p4 = por %p126_p2, %p125_p1  ;;  %s110_s23 = ssub.s32 %s610_s16, %s793_s20 }
   0xa   : > { %p439_p6 = scmp.ge.s32.totalorder %s614_s17, 1  ;;  %p113_p7 = scmp.eq.s32.totalorder %s110_s23, 0 }
   0xb   : > { %p686_p8 = por %p132_p5, %p131_p3  ;;  %p172_p9 = scmp.lt.s32.totalorder %s614_s17, 3 }
   0xc   : > { %s692_s25 = scalar_select %p113_p7, %s602_s14, %s115_s21  }
   0xd   : > { %p173_p10 = pnand %p439_p6, %p172_p9 }
   0xe   : > { %s441_s30 = sshll.u32 (!%p173_p10), %s606_s15, 1  ;;  %s451_s9 = sshll.u32 (!%p173_p10), %s606_s15, 8 }
   0xf   : > { %176 = sbr.rel (%p173_p10) target bundleno = 248 (0xf8), region = 32  ;;  %p204_p11 = scmp.lt.s32.totalorder (!%p173_p10), %s441_s30, 3 }
  0x10   : > { %s734_s18 = scalar_lea.hbm (!%p173_p10), %s784_s3, %s451_s9  ;;  %s616_s21 = smov (!%p173_p10), [#allocation2]  }
  0x11   : > { %s542_s23 = sshll.u32 (!%p173_p10), %s616_s21, 4  ;;  %s543_s23 = int_to_ptr.vmem [resolvable:$false] %s542_s23 }
  0x12   : > { %s544_s26 = scalar_lea.vmem (!%p173_p10), %s543_s23, 512 }
  0x14   : > { %v226_v0 = vld [vmem:[%s782_s1 + $0x38] sm:$0xff]  ;;  %v225_v1 = vld [vmem:[%s782_s1 + $0x30] sm:$0xff]  ;;  %v224_v2 = vld [vmem:[%s782_s1 + $0x28] sm:$0xff]  ;;  %s795_s30 = smov (!%p204_p11, %s441_s30), 3  ;;  %vm234_vm0 = vcmask 523264   ;;  %vm316_vm1 = vcmask 261120  }
  0x15   : > { %462 = vmatprep.subr.mxu0 %v226_v0  ;;  %v223_v3 = vld [vmem:[%s782_s1 + $0x20] sm:$0xff]  ;;  %s442_s8 = sshll.u32 %s795_s30, 3  ;;  %v222_v4 = vld [vmem:[%s782_s1 + $0x18] sm:$0xff]  ;;  %v221_v6 = vld [vmem:[%s782_s1 + $0x10] sm:$0xff]  ;;  %s200_s30 = sand.u32 1, %s598_s13  }
  0x16   : > { %463 = vmatpush3.msra.mxu0 %v226_v0  ;;  %s207_s19 = scalar_lea.vmem %s781_s0, %s442_s8  ;;  %v220_v7 = vld [vmem:[%s782_s1 + $0x8] sm:$0xff]  ;;  %v219_v8 = vld [vmem:[%s782_s1] sm:$0xff]  ;;  %s440_s4 = sshll.u32 %s200_s30, 4 }
  0x17   : > { %464 = vmatprep.subr.mxu0 %v225_v1  ;;  %v217_v5 = vld [vmem:[%s207_s19] sm:$0xff]  ;;  %v218_v9 = vld [vmem:[%s207_s19 + $0x8] sm:$0xff]  ;;  %s202_s7 = scalar_lea.vmem [#allocation2], %s440_s4  ;;  %s736_s19 = scalar_lea.sflag [#allocation3], %s200_s30 }
  0x18   : > { %465 = vmatpush3.msra.mxu0 %v225_v1  ;;  %478 = vmatprep.mubr.msk.f32.mxu0 %vm234_vm0, %v217_v5  ;;  %v443_v10 = vld [vmem:[%s783_s2] ss:$0 sm:$0xff]  ;;  %s334_s8 = sshll.u32 %s202_s7, 4  ;;  %s729_s8 = int_to_ptr.vmem [resolvable:$true] %s334_s8 }
  0x19   : > { %466 = vmatprep.subr.mxu0 %v224_v2  ;;  %s538_s15 = scalar_lea.vmem %s729_s8, 256  ;;  %p545_p1 = scmp.lt.s32.totalorder %s729_s8, %s543_s23 }
  0x1a   : > { %467 = vmatpush3.msra.mxu0 %v224_v2  ;;  %p539_p12 = scmp.ne.s32.totalorder %s729_s8, %s538_s15  ;;  %p546_p2 = scmp.lt.s32.totalorder %s544_s26, %s538_s15 }
  0x1b   : > { %468 = vmatprep.subr.mxu0 %v223_v3 }
  0x1c   : > { %469 = vmatpush3.msra.mxu0 %v223_v3  ;;  %p540_p13 = pnand %p539_p12, %p679_p4  ;;  %p547_p3 = por %p546_p2, %p545_p1 }
  0x1d   : > { %470 = vmatprep.subr.mxu0 %v222_v4 }
  0x1e   : > { %471 = vmatpush3.msra.mxu0 %v222_v4  ;;  %p541_p0 = pneg %p540_p13 }
  0x1f   : > { %472 = vmatprep.subr.mxu0 %v221_v6 }
  0x20   : > { %473 = vmatpush3.msra.mxu0 %v221_v6  ;;  %p548_p5 = pnand %p547_p3, %p541_p0 }
  0x21   : > { %474 = vmatprep.subr.mxu0 %v220_v7 }
  0x22   : > { %475 = vmatpush3.msra.mxu0 %v220_v7 }
  0x23   : > { %476 = vmatprep.subr.mxu0 %v219_v8 }
  0x24   : > { %477 = vmatpush3.msra.mxu0 %v219_v8 }
  0x25   : > { %479 = vmatmul.mubr.msk.f32.vlgmr.msra.gmra.mxu0 %vm234_vm0, %v218_v9 }
  0xe5   : > { %v480_v11 = vpop.f32.mrf.mxu0 }
  0xe6   : > { %v313_v12 = vadd.f32 %v480_v11, %v443_v10 }
  0xe7   : > { %v307_v13 = vpop.f32.mrf.mxu0 }
  0xe8   : > { %318 = vst.msk [vmem:[%s202_s7 + $0x8] sm:$0xff] %vm316_vm1, %v313_v12  ;;  %v308_v14 = vadd.f32 %v443_v10, %v307_v13 }
  0xea   : > { %317 = vst.msk [vmem:[%s202_s7] sm:$0xff] %vm316_vm1, %v308_v14 }
  0xeb   : > { %551 = shalt.err (!%p548_p5)
}
  0xec   : > { %s552_s27 = scalar_lea.hbm %s734_s18, 256  ;;  %s556_s30 = scalar_lea.hbm %s784_s3, 512 }
  0xed   : > { %p553_p6 = scmp.ne.s32.totalorder %s734_s18, %s552_s27  ;;  %p557_p10 = scmp.lt.s32.totalorder %s734_s18, %s784_s3 }
  0xee   : > { %p558_p11 = scmp.lt.s32.totalorder %s556_s30, %s552_s27 }
  0xef   : > { %p554_p7 = pnand %p553_p6, %p679_p4 }
  0xf0   : > { %p559_p12 = por %p558_p11, %p557_p10 }
  0xf1   : > { %p555_p9 = pneg %p554_p7 }
  0xf3   : > { %p560_p13 = pnand %p559_p12, %p555_p9 }
  0xf5   : > { %563 = shalt.err (!%p560_p13)
}
  0xf6   : > { %s617_s6 = smov 128   ;;  %s618_s7 = smov 8  }
  0xf7   : > { %481 = dma.vmem_to_hbm [thread:$0]  (%p679_p4), %s729_s8, 256, %s734_s18, %s736_s19, %s617_s6, %s617_s6, %s618_s7  }
  0xf8 PF: > { %p487_p0 = scmp.ge.s32.totalorder %s614_s17, 2  ;;  %s349_s9 = sand.u32 1, %s594_s12  }
  0xf9   : > { %s350_s10 = scalar_lea.sflag [#allocation3], %s349_s9 }
  0xfa   : > { %p484_p1 = pnand %p487_p0, %p686_p8 }
  0xfc   : > { %p485_p2 = pneg %p484_p1 }
  0xfe   : > { %589 = dma.done.wait (%p485_p2), %s350_s10, 256  }
  0xff   : > { %591 = vsyncadd (%p485_p2), %s350_s10, 4294967040  ;;  %s16_s17 = sadd.s32 1, %s614_s17   ;;  %s787_s12 = smov %s598_s13 }
 0x100   : > { %p13_p3 = scmp.ge.s32.totalorder %s16_s17, 4   ;;  %s788_s13 = smov %s602_s14 }
 0x101   : > { %s789_s14 = smov %s692_s25  ;;  %s790_s15 = smov %s610_s16 }
 0x102   : > { %s791_s16 = smov %s793_s20  ;;  %15 = sbr.rel (!%p13_p3) target bundleno = 4 (0x4), region = 73 }
 0x107   :  { %355 = vsyncpa [#allocation3], 1 }
 0x108   :  { %357 = vsyncpa [#allocation3 + $0x1], 1 }

</bundles_post_ra>
